<compile_context>
chip_gen: v6e
topology: v6e:2x2x1
jax: 0.10.0
libtpu: 0.0.40
codegen_flags: <defaults>
</compile_context>

<pallas_src>
import functools

import jax
import jax.numpy as jnp
from jax.experimental import pallas as pl
from jax.experimental.pallas import tpu as pltpu


# Conservative budget for staging the table in VMEM (counts Pallas' potential
# double-buffering of the table block).  Fits the v7x 32 MiB scoped default
# with headroom; v5e/v6e (128 MiB physical) are never the binding constraint.
_STAGED_TABLE_VMEM_BUDGET = 24 * 1024 * 1024
_TB = 8  # batch rows per grid step (sublane-dense output tile)


def _cbow_staged_kernel(idx_ref, table_ref, out_ref, *, tb, ctx, inv_c):
    """Small-vocab fast path: whole (V, D) table resident in VMEM.

    idx_ref   : (B_pad, C) int32 scalar-prefetch ref in SMEM.
    table_ref : (V, D) embedding table in VMEM (same block every step).
    out_ref   : (tb, D) f32 output tile for this batch slice.
    """
    b = pl.program_id(0)
    d = out_ref.shape[-1]
    rows = []
    for i in range(tb):                 # static unroll: tb*ctx tiny row loads
        acc = jnp.zeros((1, d), jnp.float32)
        for c in range(ctx):
            row_idx = idx_ref[b * tb + i, c]                 # SMEM scalar read
            acc = acc + table_ref[pl.ds(row_idx, 1), :].astype(jnp.float32)
        rows.append(acc)
    # Single dense (tb, D) store: tb is a multiple of 8 -> unmasked vst.
    out_ref[...] = (jnp.concatenate(rows, axis=0) * inv_c).astype(out_ref.dtype)


def _cbow_gather_kernel(idx_ref, *refs, ctx, inv_c):
    """Large-vocab fallback: C BlockSpec-gathered rows per batch element.

    refs = (row_ref_0, ..., row_ref_{C-1}, out_ref); each row_ref is the
    (1, 1, D) embedding row idx[b, c] gathered by its data-dependent index_map.
    """
    del idx_ref  # addressing data only; consumed by the index_maps
    row_refs, out_ref = refs[:ctx], refs[ctx]
    acc = row_refs[0][...].astype(jnp.float32)
    for c in range(1, ctx):
        acc = acc + row_refs[c][...].astype(jnp.float32)
    out_ref[...] = (acc * inv_c).astype(out_ref.dtype)


def cbow_forward(context_indices, in_embed_weight, *, force_gather=False):
    """CBOW.forward / CBOW.forward_context_embed: averaged context embedding."""
    B, C = context_indices.shape
    V, D = in_embed_weight.shape

    # torch.nn.Embedding raises on out-of-range indices; here we clamp so a
    # bad index can never become an out-of-bounds slice/DMA source.
    # TODO(synk): surface invalid indices instead of silently clamping.
    idx = jnp.clip(context_indices.astype(jnp.int32), 0, V - 1)

    table_bytes = V * D * in_embed_weight.dtype.itemsize
    use_staged = (not force_gather) and (2 * table_bytes <= _STAGED_TABLE_VMEM_BUDGET)

    if use_staged:
        # ---------- Fast path: stage the whole table in VMEM once ----------
        tb = _TB
        b_pad = ((B + tb - 1) // tb) * tb
        if b_pad != B:
            idx = jnp.pad(idx, ((0, b_pad - B), (0, 0)))   # pad rows use index 0

        grid_spec = pltpu.PrefetchScalarGridSpec(
            num_scalar_prefetch=1,
            grid=(b_pad // tb,),
            in_specs=[
                # Full table, constant block index -> DMA'd once, stays resident.
                pl.BlockSpec((V, D), lambda b, idx_ref: (0, 0)),
            ],
            # Sublane-dense (tb, D) output tile per step.
            out_specs=pl.BlockSpec((tb, D), lambda b, idx_ref: (b, 0)),
        )
        vmem_limit = max(16 * 1024 * 1024,
                         2 * table_bytes + 4 * tb * D * 4 + (2 << 20))
        cost = pl.CostEstimate(
            flops=2 * b_pad * C * D,
            transcendentals=0,
            bytes_accessed=table_bytes + b_pad * D * 4 + b_pad * C * 4,
        )
        out = pl.pallas_call(
            functools.partial(_cbow_staged_kernel, tb=tb, ctx=C, inv_c=1.0 / C),
            out_shape=jax.ShapeDtypeStruct((b_pad, D), jnp.float32),
            grid_spec=grid_spec,
            compiler_params=pltpu.CompilerParams(
                dimension_semantics=("parallel",),   # v7x: split batch tiles
                vmem_limit_bytes=int(vmem_limit),
            ),
            cost_estimate=cost,
        )(idx, in_embed_weight)
        return out[:B]

    # ---------- Fallback: data-dependent row gather (table > VMEM budget) ----
    # One grid step per batch row; all C context rows fetched per step via
    # data-dependent index_maps, 4-deep buffered to hide scattered-read latency.
    # TODO(synk): batch TB rows per step with manual make_async_copy gathers
    # (table in memory_space=pl.ANY) to amortize per-step cost further.
    table = in_embed_weight.reshape(V, 1, D)   # unit dim so (1, 1, D) blocks are legal
    in_specs = [
        pl.BlockSpec(
            (1, 1, D),
            lambda b, idx_ref, ci=ci: (idx_ref[b, ci], 0, 0),
            pipeline_mode=pl.Buffered(4),
        )
        for ci in range(C)
    ]
    grid_spec = pltpu.PrefetchScalarGridSpec(
        num_scalar_prefetch=1,
        grid=(B,),
        in_specs=in_specs,
        out_specs=pl.BlockSpec((1, 1, D), lambda b, idx_ref: (b, 0, 0)),
    )
    cost = pl.CostEstimate(
        flops=2 * B * C * D,
        transcendentals=0,
        bytes_accessed=B * C * D * in_embed_weight.dtype.itemsize + B * D * 4 + B * C * 4,
    )
    out = pl.pallas_call(
        functools.partial(_cbow_gather_kernel, ctx=C, inv_c=1.0 / C),
        out_shape=jax.ShapeDtypeStruct((B, 1, D), jnp.float32),
        grid_spec=grid_spec,
        compiler_params=pltpu.CompilerParams(
            dimension_semantics=("parallel",),
            vmem_limit_bytes=16 * 1024 * 1024,
        ),
        cost_estimate=cost,
    )(idx, *([table] * C))
    return out.reshape(B, D)


def cbow_forward_output_embeds(indices, out_embed_weight):
    # Plain-JAX glue for CBOW.forward_output_embeds (simple row gather used by
    # the NS loss outside the module's forward(); the hot path is the kernel).
    return jnp.take(out_embed_weight, indices, axis=0)


if __name__ == "__main__":
    # Small, deterministic setup consistent with the module's __init__.
    vocab_size = 256
    embedding_dim = 128   # multiple of 128 -> lane-dense rows / output stores
    batch_size = 32       # 4 grid steps of TB=8 -> both v7x cores get work
    context_size = 4

    key = jax.random.PRNGKey(0)
    k_in, k_out, k_idx = jax.random.split(key, 3)

    init_range = 0.5 / embedding_dim
    in_embed = jax.random.uniform(
        k_in, (vocab_size, embedding_dim), jnp.float32,
        minval=-init_range, maxval=init_range)
    out_embed = jax.random.uniform(
        k_out, (vocab_size, embedding_dim), jnp.float32,
        minval=-init_range, maxval=init_range)

    context_indices = jax.random.randint(
        k_idx, (batch_size, context_size), 0, vocab_size, dtype=jnp.int32)

    # Reference: plain-JAX embedding lookup + mean.
    ref = jnp.take(in_embed, context_indices, axis=0).mean(axis=1)

    # Primary path (table staged in VMEM).
    out = jax.block_until_ready(cbow_forward(context_indices, in_embed))
    assert out.shape == (batch_size, embedding_dim)
    assert jnp.allclose(out, ref, atol=1e-6, rtol=1e-6)

    # Also exercise the large-vocab fallback (BlockSpec row gather) path.
    out_g = jax.block_until_ready(
        cbow_forward(context_indices, in_embed, force_gather=True))
    assert out_g.shape == (batch_size, embedding_dim)
    assert jnp.allclose(out_g, ref, atol=1e-6, rtol=1e-6)

    # Exercise the output-embedding glue path too.
    neg = cbow_forward_output_embeds(context_indices[:, 0], out_embed)
    assert neg.shape == (batch_size, embedding_dim)

    print("KERNEL_OK")
</pallas_src>

<mosaic_0001>
module attributes {stable_mosaic.version = 11 : i64} {
  func.func @_cbow_staged_kernel(%arg0: i32, %arg1: memref<32x4xi32, #tpu.memory_space<smem>>, %arg2: memref<256x128xf32, #tpu.memory_space<vmem>>, %arg3: memref<8x128xf32, #tpu.memory_space<vmem>>) attributes {dimension_semantics = [#tpu.dimension_semantics<parallel>], iteration_bounds = array<i64: 4>, scalar_prefetch = 1 : i64, scratch_operands = 0 : i64, tpu.core_type = #tpu.core_type<tc>, window_params = [{pipeline_mode = #tpu.pipeline_mode<synchronous>, transform_indices = @transform_0, window_bounds = array<i64: 256, 128>}, {transform_indices = @transform_1, window_bounds = array<i64: 8, 128>}]} {
    %cst = arith.constant 0.000000e+00 : f32
    %0 = vector.broadcast %cst : f32 to vector<1x128xf32>
    %c8_i32 = arith.constant 8 : i32
    %1 = arith.muli %arg0, %c8_i32 : i32
    %c0_i32 = arith.constant 0 : i32
    %2 = arith.addi %1, %c0_i32 : i32
    %3 = arith.index_cast %2 : i32 to index
    %c0 = arith.constant 0 : index
    %4 = memref.load %arg1[%3, %c0] : memref<32x4xi32, #tpu.memory_space<smem>>
    %5 = arith.index_cast %4 : i32 to index
    %c0_0 = arith.constant 0 : index
    %6 = vector.load %arg2[%5, %c0_0] : memref<256x128xf32, #tpu.memory_space<vmem>>, vector<1x128xf32>
    %7 = arith.addf %0, %6 : vector<1x128xf32>
    %c8_i32_1 = arith.constant 8 : i32
    %8 = arith.muli %arg0, %c8_i32_1 : i32
    %c0_i32_2 = arith.constant 0 : i32
    %9 = arith.addi %8, %c0_i32_2 : i32
    %10 = arith.index_cast %9 : i32 to index
    %c1 = arith.constant 1 : index
    %11 = memref.load %arg1[%10, %c1] : memref<32x4xi32, #tpu.memory_space<smem>>
    %12 = arith.index_cast %11 : i32 to index
    %c0_3 = arith.constant 0 : index
    %13 = vector.load %arg2[%12, %c0_3] : memref<256x128xf32, #tpu.memory_space<vmem>>, vector<1x128xf32>
    %14 = arith.addf %7, %13 : vector<1x128xf32>
    %c8_i32_4 = arith.constant 8 : i32
    %15 = arith.muli %arg0, %c8_i32_4 : i32
    %c0_i32_5 = arith.constant 0 : i32
    %16 = arith.addi %15, %c0_i32_5 : i32
    %17 = arith.index_cast %16 : i32 to index
    %c2 = arith.constant 2 : index
    %18 = memref.load %arg1[%17, %c2] : memref<32x4xi32, #tpu.memory_space<smem>>
    %19 = arith.index_cast %18 : i32 to index
    %c0_6 = arith.constant 0 : index
    %20 = vector.load %arg2[%19, %c0_6] : memref<256x128xf32, #tpu.memory_space<vmem>>, vector<1x128xf32>
    %21 = arith.addf %14, %20 : vector<1x128xf32>
    %c8_i32_7 = arith.constant 8 : i32
    %22 = arith.muli %arg0, %c8_i32_7 : i32
    %c0_i32_8 = arith.constant 0 : i32
    %23 = arith.addi %22, %c0_i32_8 : i32
    %24 = arith.index_cast %23 : i32 to index
    %c3 = arith.constant 3 : index
    %25 = memref.load %arg1[%24, %c3] : memref<32x4xi32, #tpu.memory_space<smem>>
    %26 = arith.index_cast %25 : i32 to index
    %c0_9 = arith.constant 0 : index
    %27 = vector.load %arg2[%26, %c0_9] : memref<256x128xf32, #tpu.memory_space<vmem>>, vector<1x128xf32>
    %28 = arith.addf %21, %27 : vector<1x128xf32>
    %cst_10 = arith.constant 0.000000e+00 : f32
    %29 = vector.broadcast %cst_10 : f32 to vector<1x128xf32>
    %c8_i32_11 = arith.constant 8 : i32
    %30 = arith.muli %arg0, %c8_i32_11 : i32
    %c1_i32 = arith.constant 1 : i32
    %31 = arith.addi %30, %c1_i32 : i32
    %32 = arith.index_cast %31 : i32 to index
    %c0_12 = arith.constant 0 : index
    %33 = memref.load %arg1[%32, %c0_12] : memref<32x4xi32, #tpu.memory_space<smem>>
    %34 = arith.index_cast %33 : i32 to index
    %c0_13 = arith.constant 0 : index
    %35 = vector.load %arg2[%34, %c0_13] : memref<256x128xf32, #tpu.memory_space<vmem>>, vector<1x128xf32>
    %36 = arith.addf %29, %35 : vector<1x128xf32>
    %c8_i32_14 = arith.constant 8 : i32
    %37 = arith.muli %arg0, %c8_i32_14 : i32
    %c1_i32_15 = arith.constant 1 : i32
    %38 = arith.addi %37, %c1_i32_15 : i32
    %39 = arith.index_cast %38 : i32 to index
    %c1_16 = arith.constant 1 : index
    %40 = memref.load %arg1[%39, %c1_16] : memref<32x4xi32, #tpu.memory_space<smem>>
    %41 = arith.index_cast %40 : i32 to index
    %c0_17 = arith.constant 0 : index
    %42 = vector.load %arg2[%41, %c0_17] : memref<256x128xf32, #tpu.memory_space<vmem>>, vector<1x128xf32>
    %43 = arith.addf %36, %42 : vector<1x128xf32>
    %c8_i32_18 = arith.constant 8 : i32
    %44 = arith.muli %arg0, %c8_i32_18 : i32
    %c1_i32_19 = arith.constant 1 : i32
    %45 = arith.addi %44, %c1_i32_19 : i32
    %46 = arith.index_cast %45 : i32 to index
    %c2_20 = arith.constant 2 : index
    %47 = memref.load %arg1[%46, %c2_20] : memref<32x4xi32, #tpu.memory_space<smem>>
    %48 = arith.index_cast %47 : i32 to index
    %c0_21 = arith.constant 0 : index
    %49 = vector.load %arg2[%48, %c0_21] : memref<256x128xf32, #tpu.memory_space<vmem>>, vector<1x128xf32>
    %50 = arith.addf %43, %49 : vector<1x128xf32>
    %c8_i32_22 = arith.constant 8 : i32
    %51 = arith.muli %arg0, %c8_i32_22 : i32
    %c1_i32_23 = arith.constant 1 : i32
    %52 = arith.addi %51, %c1_i32_23 : i32
    %53 = arith.index_cast %52 : i32 to index
    %c3_24 = arith.constant 3 : index
    %54 = memref.load %arg1[%53, %c3_24] : memref<32x4xi32, #tpu.memory_space<smem>>
    %55 = arith.index_cast %54 : i32 to index
    %c0_25 = arith.constant 0 : index
    %56 = vector.load %arg2[%55, %c0_25] : memref<256x128xf32, #tpu.memory_space<vmem>>, vector<1x128xf32>
    %57 = arith.addf %50, %56 : vector<1x128xf32>
    %cst_26 = arith.constant 0.000000e+00 : f32
    %58 = vector.broadcast %cst_26 : f32 to vector<1x128xf32>
    %c8_i32_27 = arith.constant 8 : i32
    %59 = arith.muli %arg0, %c8_i32_27 : i32
    %c2_i32 = arith.constant 2 : i32
    %60 = arith.addi %59, %c2_i32 : i32
    %61 = arith.index_cast %60 : i32 to index
    %c0_28 = arith.constant 0 : index
    %62 = memref.load %arg1[%61, %c0_28] : memref<32x4xi32, #tpu.memory_space<smem>>
    %63 = arith.index_cast %62 : i32 to index
    %c0_29 = arith.constant 0 : index
    %64 = vector.load %arg2[%63, %c0_29] : memref<256x128xf32, #tpu.memory_space<vmem>>, vector<1x128xf32>
    %65 = arith.addf %58, %64 : vector<1x128xf32>
    %c8_i32_30 = arith.constant 8 : i32
    %66 = arith.muli %arg0, %c8_i32_30 : i32
    %c2_i32_31 = arith.constant 2 : i32
    %67 = arith.addi %66, %c2_i32_31 : i32
    %68 = arith.index_cast %67 : i32 to index
    %c1_32 = arith.constant 1 : index
    %69 = memref.load %arg1[%68, %c1_32] : memref<32x4xi32, #tpu.memory_space<smem>>
    %70 = arith.index_cast %69 : i32 to index
    %c0_33 = arith.constant 0 : index
    %71 = vector.load %arg2[%70, %c0_33] : memref<256x128xf32, #tpu.memory_space<vmem>>, vector<1x128xf32>
    %72 = arith.addf %65, %71 : vector<1x128xf32>
    %c8_i32_34 = arith.constant 8 : i32
    %73 = arith.muli %arg0, %c8_i32_34 : i32
    %c2_i32_35 = arith.constant 2 : i32
    %74 = arith.addi %73, %c2_i32_35 : i32
    %75 = arith.index_cast %74 : i32 to index
    %c2_36 = arith.constant 2 : index
    %76 = memref.load %arg1[%75, %c2_36] : memref<32x4xi32, #tpu.memory_space<smem>>
    %77 = arith.index_cast %76 : i32 to index
    %c0_37 = arith.constant 0 : index
    %78 = vector.load %arg2[%77, %c0_37] : memref<256x128xf32, #tpu.memory_space<vmem>>, vector<1x128xf32>
    %79 = arith.addf %72, %78 : vector<1x128xf32>
    %c8_i32_38 = arith.constant 8 : i32
    %80 = arith.muli %arg0, %c8_i32_38 : i32
    %c2_i32_39 = arith.constant 2 : i32
    %81 = arith.addi %80, %c2_i32_39 : i32
    %82 = arith.index_cast %81 : i32 to index
    %c3_40 = arith.constant 3 : index
    %83 = memref.load %arg1[%82, %c3_40] : memref<32x4xi32, #tpu.memory_space<smem>>
    %84 = arith.index_cast %83 : i32 to index
    %c0_41 = arith.constant 0 : index
    %85 = vector.load %arg2[%84, %c0_41] : memref<256x128xf32, #tpu.memory_space<vmem>>, vector<1x128xf32>
    %86 = arith.addf %79, %85 : vector<1x128xf32>
    %cst_42 = arith.constant 0.000000e+00 : f32
    %87 = vector.broadcast %cst_42 : f32 to vector<1x128xf32>
    %c8_i32_43 = arith.constant 8 : i32
    %88 = arith.muli %arg0, %c8_i32_43 : i32
    %c3_i32 = arith.constant 3 : i32
    %89 = arith.addi %88, %c3_i32 : i32
    %90 = arith.index_cast %89 : i32 to index
    %c0_44 = arith.constant 0 : index
    %91 = memref.load %arg1[%90, %c0_44] : memref<32x4xi32, #tpu.memory_space<smem>>
    %92 = arith.index_cast %91 : i32 to index
    %c0_45 = arith.constant 0 : index
    %93 = vector.load %arg2[%92, %c0_45] : memref<256x128xf32, #tpu.memory_space<vmem>>, vector<1x128xf32>
    %94 = arith.addf %87, %93 : vector<1x128xf32>
    %c8_i32_46 = arith.constant 8 : i32
    %95 = arith.muli %arg0, %c8_i32_46 : i32
    %c3_i32_47 = arith.constant 3 : i32
    %96 = arith.addi %95, %c3_i32_47 : i32
    %97 = arith.index_cast %96 : i32 to index
    %c1_48 = arith.constant 1 : index
    %98 = memref.load %arg1[%97, %c1_48] : memref<32x4xi32, #tpu.memory_space<smem>>
    %99 = arith.index_cast %98 : i32 to index
    %c0_49 = arith.constant 0 : index
    %100 = vector.load %arg2[%99, %c0_49] : memref<256x128xf32, #tpu.memory_space<vmem>>, vector<1x128xf32>
    %101 = arith.addf %94, %100 : vector<1x128xf32>
    %c8_i32_50 = arith.constant 8 : i32
    %102 = arith.muli %arg0, %c8_i32_50 : i32
    %c3_i32_51 = arith.constant 3 : i32
    %103 = arith.addi %102, %c3_i32_51 : i32
    %104 = arith.index_cast %103 : i32 to index
    %c2_52 = arith.constant 2 : index
    %105 = memref.load %arg1[%104, %c2_52] : memref<32x4xi32, #tpu.memory_space<smem>>
    %106 = arith.index_cast %105 : i32 to index
    %c0_53 = arith.constant 0 : index
    %107 = vector.load %arg2[%106, %c0_53] : memref<256x128xf32, #tpu.memory_space<vmem>>, vector<1x128xf32>
    %108 = arith.addf %101, %107 : vector<1x128xf32>
    %c8_i32_54 = arith.constant 8 : i32
    %109 = arith.muli %arg0, %c8_i32_54 : i32
    %c3_i32_55 = arith.constant 3 : i32
    %110 = arith.addi %109, %c3_i32_55 : i32
    %111 = arith.index_cast %110 : i32 to index
    %c3_56 = arith.constant 3 : index
    %112 = memref.load %arg1[%111, %c3_56] : memref<32x4xi32, #tpu.memory_space<smem>>
    %113 = arith.index_cast %112 : i32 to index
    %c0_57 = arith.constant 0 : index
    %114 = vector.load %arg2[%113, %c0_57] : memref<256x128xf32, #tpu.memory_space<vmem>>, vector<1x128xf32>
    %115 = arith.addf %108, %114 : vector<1x128xf32>
    %cst_58 = arith.constant 0.000000e+00 : f32
    %116 = vector.broadcast %cst_58 : f32 to vector<1x128xf32>
    %c8_i32_59 = arith.constant 8 : i32
    %117 = arith.muli %arg0, %c8_i32_59 : i32
    %c4_i32 = arith.constant 4 : i32
    %118 = arith.addi %117, %c4_i32 : i32
    %119 = arith.index_cast %118 : i32 to index
    %c0_60 = arith.constant 0 : index
    %120 = memref.load %arg1[%119, %c0_60] : memref<32x4xi32, #tpu.memory_space<smem>>
    %121 = arith.index_cast %120 : i32 to index
    %c0_61 = arith.constant 0 : index
    %122 = vector.load %arg2[%121, %c0_61] : memref<256x128xf32, #tpu.memory_space<vmem>>, vector<1x128xf32>
    %123 = arith.addf %116, %122 : vector<1x128xf32>
    %c8_i32_62 = arith.constant 8 : i32
    %124 = arith.muli %arg0, %c8_i32_62 : i32
    %c4_i32_63 = arith.constant 4 : i32
    %125 = arith.addi %124, %c4_i32_63 : i32
    %126 = arith.index_cast %125 : i32 to index
    %c1_64 = arith.constant 1 : index
    %127 = memref.load %arg1[%126, %c1_64] : memref<32x4xi32, #tpu.memory_space<smem>>
    %128 = arith.index_cast %127 : i32 to index
    %c0_65 = arith.constant 0 : index
    %129 = vector.load %arg2[%128, %c0_65] : memref<256x128xf32, #tpu.memory_space<vmem>>, vector<1x128xf32>
    %130 = arith.addf %123, %129 : vector<1x128xf32>
    %c8_i32_66 = arith.constant 8 : i32
    %131 = arith.muli %arg0, %c8_i32_66 : i32
    %c4_i32_67 = arith.constant 4 : i32
    %132 = arith.addi %131, %c4_i32_67 : i32
    %133 = arith.index_cast %132 : i32 to index
    %c2_68 = arith.constant 2 : index
    %134 = memref.load %arg1[%133, %c2_68] : memref<32x4xi32, #tpu.memory_space<smem>>
    %135 = arith.index_cast %134 : i32 to index
    %c0_69 = arith.constant 0 : index
    %136 = vector.load %arg2[%135, %c0_69] : memref<256x128xf32, #tpu.memory_space<vmem>>, vector<1x128xf32>
    %137 = arith.addf %130, %136 : vector<1x128xf32>
    %c8_i32_70 = arith.constant 8 : i32
    %138 = arith.muli %arg0, %c8_i32_70 : i32
    %c4_i32_71 = arith.constant 4 : i32
    %139 = arith.addi %138, %c4_i32_71 : i32
    %140 = arith.index_cast %139 : i32 to index
    %c3_72 = arith.constant 3 : index
    %141 = memref.load %arg1[%140, %c3_72] : memref<32x4xi32, #tpu.memory_space<smem>>
    %142 = arith.index_cast %141 : i32 to index
    %c0_73 = arith.constant 0 : index
    %143 = vector.load %arg2[%142, %c0_73] : memref<256x128xf32, #tpu.memory_space<vmem>>, vector<1x128xf32>
    %144 = arith.addf %137, %143 : vector<1x128xf32>
    %cst_74 = arith.constant 0.000000e+00 : f32
    %145 = vector.broadcast %cst_74 : f32 to vector<1x128xf32>
    %c8_i32_75 = arith.constant 8 : i32
    %146 = arith.muli %arg0, %c8_i32_75 : i32
    %c5_i32 = arith.constant 5 : i32
    %147 = arith.addi %146, %c5_i32 : i32
    %148 = arith.index_cast %147 : i32 to index
    %c0_76 = arith.constant 0 : index
    %149 = memref.load %arg1[%148, %c0_76] : memref<32x4xi32, #tpu.memory_space<smem>>
    %150 = arith.index_cast %149 : i32 to index
    %c0_77 = arith.constant 0 : index
    %151 = vector.load %arg2[%150, %c0_77] : memref<256x128xf32, #tpu.memory_space<vmem>>, vector<1x128xf32>
    %152 = arith.addf %145, %151 : vector<1x128xf32>
    %c8_i32_78 = arith.constant 8 : i32
    %153 = arith.muli %arg0, %c8_i32_78 : i32
    %c5_i32_79 = arith.constant 5 : i32
    %154 = arith.addi %153, %c5_i32_79 : i32
    %155 = arith.index_cast %154 : i32 to index
    %c1_80 = arith.constant 1 : index
    %156 = memref.load %arg1[%155, %c1_80] : memref<32x4xi32, #tpu.memory_space<smem>>
    %157 = arith.index_cast %156 : i32 to index
    %c0_81 = arith.constant 0 : index
    %158 = vector.load %arg2[%157, %c0_81] : memref<256x128xf32, #tpu.memory_space<vmem>>, vector<1x128xf32>
    %159 = arith.addf %152, %158 : vector<1x128xf32>
    %c8_i32_82 = arith.constant 8 : i32
    %160 = arith.muli %arg0, %c8_i32_82 : i32
    %c5_i32_83 = arith.constant 5 : i32
    %161 = arith.addi %160, %c5_i32_83 : i32
    %162 = arith.index_cast %161 : i32 to index
    %c2_84 = arith.constant 2 : index
    %163 = memref.load %arg1[%162, %c2_84] : memref<32x4xi32, #tpu.memory_space<smem>>
    %164 = arith.index_cast %163 : i32 to index
    %c0_85 = arith.constant 0 : index
    %165 = vector.load %arg2[%164, %c0_85] : memref<256x128xf32, #tpu.memory_space<vmem>>, vector<1x128xf32>
    %166 = arith.addf %159, %165 : vector<1x128xf32>
    %c8_i32_86 = arith.constant 8 : i32
    %167 = arith.muli %arg0, %c8_i32_86 : i32
    %c5_i32_87 = arith.constant 5 : i32
    %168 = arith.addi %167, %c5_i32_87 : i32
    %169 = arith.index_cast %168 : i32 to index
    %c3_88 = arith.constant 3 : index
    %170 = memref.load %arg1[%169, %c3_88] : memref<32x4xi32, #tpu.memory_space<smem>>
    %171 = arith.index_cast %170 : i32 to index
    %c0_89 = arith.constant 0 : index
    %172 = vector.load %arg2[%171, %c0_89] : memref<256x128xf32, #tpu.memory_space<vmem>>, vector<1x128xf32>
    %173 = arith.addf %166, %172 : vector<1x128xf32>
    %cst_90 = arith.constant 0.000000e+00 : f32
    %174 = vector.broadcast %cst_90 : f32 to vector<1x128xf32>
    %c8_i32_91 = arith.constant 8 : i32
    %175 = arith.muli %arg0, %c8_i32_91 : i32
    %c6_i32 = arith.constant 6 : i32
    %176 = arith.addi %175, %c6_i32 : i32
    %177 = arith.index_cast %176 : i32 to index
    %c0_92 = arith.constant 0 : index
    %178 = memref.load %arg1[%177, %c0_92] : memref<32x4xi32, #tpu.memory_space<smem>>
    %179 = arith.index_cast %178 : i32 to index
    %c0_93 = arith.constant 0 : index
    %180 = vector.load %arg2[%179, %c0_93] : memref<256x128xf32, #tpu.memory_space<vmem>>, vector<1x128xf32>
    %181 = arith.addf %174, %180 : vector<1x128xf32>
    %c8_i32_94 = arith.constant 8 : i32
    %182 = arith.muli %arg0, %c8_i32_94 : i32
    %c6_i32_95 = arith.constant 6 : i32
    %183 = arith.addi %182, %c6_i32_95 : i32
    %184 = arith.index_cast %183 : i32 to index
    %c1_96 = arith.constant 1 : index
    %185 = memref.load %arg1[%184, %c1_96] : memref<32x4xi32, #tpu.memory_space<smem>>
    %186 = arith.index_cast %185 : i32 to index
    %c0_97 = arith.constant 0 : index
    %187 = vector.load %arg2[%186, %c0_97] : memref<256x128xf32, #tpu.memory_space<vmem>>, vector<1x128xf32>
    %188 = arith.addf %181, %187 : vector<1x128xf32>
    %c8_i32_98 = arith.constant 8 : i32
    %189 = arith.muli %arg0, %c8_i32_98 : i32
    %c6_i32_99 = arith.constant 6 : i32
    %190 = arith.addi %189, %c6_i32_99 : i32
    %191 = arith.index_cast %190 : i32 to index
    %c2_100 = arith.constant 2 : index
    %192 = memref.load %arg1[%191, %c2_100] : memref<32x4xi32, #tpu.memory_space<smem>>
    %193 = arith.index_cast %192 : i32 to index
    %c0_101 = arith.constant 0 : index
    %194 = vector.load %arg2[%193, %c0_101] : memref<256x128xf32, #tpu.memory_space<vmem>>, vector<1x128xf32>
    %195 = arith.addf %188, %194 : vector<1x128xf32>
    %c8_i32_102 = arith.constant 8 : i32
    %196 = arith.muli %arg0, %c8_i32_102 : i32
    %c6_i32_103 = arith.constant 6 : i32
    %197 = arith.addi %196, %c6_i32_103 : i32
    %198 = arith.index_cast %197 : i32 to index
    %c3_104 = arith.constant 3 : index
    %199 = memref.load %arg1[%198, %c3_104] : memref<32x4xi32, #tpu.memory_space<smem>>
    %200 = arith.index_cast %199 : i32 to index
    %c0_105 = arith.constant 0 : index
    %201 = vector.load %arg2[%200, %c0_105] : memref<256x128xf32, #tpu.memory_space<vmem>>, vector<1x128xf32>
    %202 = arith.addf %195, %201 : vector<1x128xf32>
    %cst_106 = arith.constant 0.000000e+00 : f32
    %203 = vector.broadcast %cst_106 : f32 to vector<1x128xf32>
    %c8_i32_107 = arith.constant 8 : i32
    %204 = arith.muli %arg0, %c8_i32_107 : i32
    %c7_i32 = arith.constant 7 : i32
    %205 = arith.addi %204, %c7_i32 : i32
    %206 = arith.index_cast %205 : i32 to index
    %c0_108 = arith.constant 0 : index
    %207 = memref.load %arg1[%206, %c0_108] : memref<32x4xi32, #tpu.memory_space<smem>>
    %208 = arith.index_cast %207 : i32 to index
    %c0_109 = arith.constant 0 : index
    %209 = vector.load %arg2[%208, %c0_109] : memref<256x128xf32, #tpu.memory_space<vmem>>, vector<1x128xf32>
    %210 = arith.addf %203, %209 : vector<1x128xf32>
    %c8_i32_110 = arith.constant 8 : i32
    %211 = arith.muli %arg0, %c8_i32_110 : i32
    %c7_i32_111 = arith.constant 7 : i32
    %212 = arith.addi %211, %c7_i32_111 : i32
    %213 = arith.index_cast %212 : i32 to index
    %c1_112 = arith.constant 1 : index
    %214 = memref.load %arg1[%213, %c1_112] : memref<32x4xi32, #tpu.memory_space<smem>>
    %215 = arith.index_cast %214 : i32 to index
    %c0_113 = arith.constant 0 : index
    %216 = vector.load %arg2[%215, %c0_113] : memref<256x128xf32, #tpu.memory_space<vmem>>, vector<1x128xf32>
    %217 = arith.addf %210, %216 : vector<1x128xf32>
    %c8_i32_114 = arith.constant 8 : i32
    %218 = arith.muli %arg0, %c8_i32_114 : i32
    %c7_i32_115 = arith.constant 7 : i32
    %219 = arith.addi %218, %c7_i32_115 : i32
    %220 = arith.index_cast %219 : i32 to index
    %c2_116 = arith.constant 2 : index
    %221 = memref.load %arg1[%220, %c2_116] : memref<32x4xi32, #tpu.memory_space<smem>>
    %222 = arith.index_cast %221 : i32 to index
    %c0_117 = arith.constant 0 : index
    %223 = vector.load %arg2[%222, %c0_117] : memref<256x128xf32, #tpu.memory_space<vmem>>, vector<1x128xf32>
    %224 = arith.addf %217, %223 : vector<1x128xf32>
    %c8_i32_118 = arith.constant 8 : i32
    %225 = arith.muli %arg0, %c8_i32_118 : i32
    %c7_i32_119 = arith.constant 7 : i32
    %226 = arith.addi %225, %c7_i32_119 : i32
    %227 = arith.index_cast %226 : i32 to index
    %c3_120 = arith.constant 3 : index
    %228 = memref.load %arg1[%227, %c3_120] : memref<32x4xi32, #tpu.memory_space<smem>>
    %229 = arith.index_cast %228 : i32 to index
    %c0_121 = arith.constant 0 : index
    %230 = vector.load %arg2[%229, %c0_121] : memref<256x128xf32, #tpu.memory_space<vmem>>, vector<1x128xf32>
    %231 = arith.addf %224, %230 : vector<1x128xf32>
    %232 = tpu.concatenate %28, %57, %86, %115, %144, %173, %202, %231 in 0 : vector<1x128xf32>, vector<1x128xf32>, vector<1x128xf32>, vector<1x128xf32>, vector<1x128xf32>, vector<1x128xf32>, vector<1x128xf32>, vector<1x128xf32> -> vector<8x128xf32>
    %cst_122 = arith.constant 2.500000e-01 : f32
    %233 = vector.broadcast %cst_122 : f32 to vector<8x128xf32>
    %234 = arith.mulf %232, %233 : vector<8x128xf32>
    %c0_123 = arith.constant 0 : index
    %c0_124 = arith.constant 0 : index
    %235 = vector.load %arg3[%c0_123, %c0_124] : memref<8x128xf32, #tpu.memory_space<vmem>>, vector<8x128xf32>
    tpu.vector_store %arg3[%c0_123, %c0_124], %234 {strides = array<i32>} : memref<8x128xf32, #tpu.memory_space<vmem>>, vector<8x128xf32>,
    return
  }
  func.func @transform_0(%arg0: i32, %arg1: memref<32x4xi32, #tpu.memory_space<smem>>) -> (i32, i32) {
    %c0_i32 = arith.constant 0 : i32
    %c0_i32_0 = arith.constant 0 : i32
    %c0_i32_1 = arith.constant 0 : i32
    return %c0_i32, %c0_i32_0 : i32, i32
  }
  func.func @transform_1(%arg0: i32, %arg1: memref<32x4xi32, #tpu.memory_space<smem>>) -> (i32, i32) {
    %c0_i32 = arith.constant 0 : i32
    %c0_i32_0 = arith.constant 0 : i32
    return %arg0, %c0_i32 : i32, i32
  }
}

</mosaic_0001>

<bundles_post_ra>
// kernel: tpu_custom_call.1
= control target key start
LH: loop header
LB: loop body
LE: loop exit
PB: predicated region body
PF: predicated region fallthrough
CT: control target
= control target key end

     0   :  { %s861_s0 = inlined_call_operand.vmem [shape: s32[32,4], index: 0, kind: input, shape index: {}]   ;;  %s862_s1 = inlined_call_operand.hbm [shape: f32[256,128], index: 1, kind: input, shape index: {}]   ;;  %s863_s2 = inlined_call_operand.hbm [shape: f32[32,128], index: 2, kind: output, shape index: {}]  }
   0x1   :  { %869 = sst [smem:[#allocation16_spill]] %s862_s1  ;;  %s7_s11 = sshll.u32 %s861_s0, 4  ;;  %s8_s11 = int_to_ptr.vmem [resolvable:$true] %s7_s11 }
   0x2   :  { %s521_s12 = scalar_lea.vmem %s8_s11, 512  ;;  %p526_p1 = scmp.lt.s32.totalorder %s8_s11, %s8_s11 }
   0x3   :  { %p522_p0 = scmp.ne.s32.totalorder %s8_s11, %s521_s12  ;;  %p527_p2 = scmp.lt.s32.totalorder %s521_s12, %s521_s12 }
   0x5   :  { %p528_p3 = por %p527_p2, %p526_p1 }
   0x7   :  { %p529_p4 = pnand %p528_p3, %p522_p0 }
   0x9   :  { %532 = shalt.err (!%p529_p4)  }
   0xa   :  { %s627_s13 = smov [#allocation3]  }
   0xb   :  { %10 = dma.vmem_to_smem %s8_s11, 512, %s627_s13, [#allocation2] }
   0xc   :  { %601 = dma.done.wait [#allocation2], 512 }
   0xd   :  { %602 = vsyncadd [#allocation2], 4294966784 }
   0xe   :  { %12 = sfence }
   0xf   :  { %13 = vsyncpa [#allocation5], 0 }
  0x10   :  { %14 = vsyncpa [#allocation6], 0 }
  0x11   :  { %16 = vsyncpa [#allocation6 + $0x1], 0  ;;  %s650_s14 = smov 0   ;;  %s652_s15 = smov 0  }
  0x12   :  { %s654_s0 = smov 0   ;;  %s656_s16 = smov 0  }
  0x13 LB: > { %870 = sst [smem:[#allocation11_spill]] %s613_s14  ;;  %s671_s17 = sadd.s32 4294967295, %s625_s16   ;;  %s625_s16 = sphi %s656_s16, %s882_s16   ;;  %s621_s0 = sphi %s654_s0, %s884_s0   ;;  %s617_s15 = sphi %s652_s15, %s886_s15   ;;  %s613_s14 = sphi %s650_s14, %s885_s14  }
  0x14   : > { %871 = sst [smem:[#allocation12_spill]] %s621_s0  ;;  %s427_s18 = sadd.s32 4294967294, %s625_s16  }
  0x15   : > { %s675_s19 = sadd.s32 1, %s625_s16   ;;  %s50_s20 = sadd.s32 1, %s621_s0 }
  0x16   : > { %872 = sst [smem:[#allocation13_spill]] %s675_s19  ;;  %s47_s21 = ssub.s32 %s625_s16, %s675_s19 }
  0x17   : > { %p60_p5 = scmp.ne.s32.totalorder %s621_s0, %s617_s15  ;;  %p48_p6 = scmp.eq.s32.totalorder %s47_s21, 0 }
  0x18   : > { %p61_p7 = scmp.eq.s32.totalorder %s671_s17, 3  ;;  %p66_p8 = scmp.ne.s32.totalorder %s617_s15, %s613_s14 }
  0x19   : > { %p67_p9 = scmp.eq.s32.totalorder %s427_s18, 3  ;;  %p428_p12 = scmp.ge.s32.totalorder %s625_s16, 1 }
  0x1a   : > { %s686_s22 = scalar_select %p48_p6, %s621_s0, %s50_s20  }
  0x1b   : > { %p688_p10 = por %p61_p7, %p60_p5  ;;  %p692_p11 = por %p67_p9, %p66_p8 }
  0x1c   : > { %873 = sst [smem:[#allocation14_spill]] %s686_s22  ;;  %p74_p13 = scmp.lt.s32.totalorder %s625_s16, 5 }
  0x1d   : > { %s875_s24 = scalar_select %p692_p11, 1, 0 }
  0x1e   : > { %p482_p0 = scmp.eq.s32.totalorder %s671_s17, 0  ;;  %p699_p1 = pnand %p428_p12, %p74_p13 }
  0x1f   : > { %876 = sst [smem:[#allocation15_spill]] %s875_s24  ;;  %s628_s26 = smov [#allocation4]  }
  0x20   : > { %s86_s27 = sshll.u32 %s628_s26, 4  ;;  %p474_p2 = pneg %p699_p1  ;;  %s87_s27 = int_to_ptr.vmem [resolvable:$true] %s86_s27 }
  0x21   : > { %s544_s28 = scalar_lea.vmem %s87_s27, 4096  ;;  %p552_p8 = scmp.lt.s32.totalorder %s87_s27, %s87_s27 }
  0x22   : > { %p475_p3 = pnand %p482_p0, %p474_p2  ;;  %p545_p5 = scmp.ne.s32.totalorder %s87_s27, %s544_s28 }
  0x23   : > { %p553_p9 = scmp.lt.s32.totalorder %s544_s28, %s544_s28 }
  0x24   : > { %p535_p4 = pneg %p475_p3 }
  0x25   : > { %p554_p11 = por %p553_p9, %p552_p8 }
  0x26   : > { %p547_p6 = pnand %p545_p5, %p535_p4 }
  0x28   : > { %p548_p7 = pneg %p547_p6 }
  0x2a   : > { %p555_p12 = pnand %p554_p11, %p548_p7 }
  0x2c   : > { %558 = shalt.err (!%p555_p12)
}
  0x2d   : > { %s629_s29 = smov 128   ;;  %s630_s30 = smov 8  }
  0x2e   : > { %s878_s1 = sld [smem:[#allocation16_spill]] }
  0x30   : > { %102 = sbr.rel (%p699_p1) target bundleno = 129 (0x81), region = 24 }
  0x34   : > { %477 = dma.hbm_to_vmem [thread:$0]  (!%p475_p3), %s878_s1, 4096, %s87_s27, [#allocation5], %s629_s29, %s629_s29, %s630_s30  }
  0x35   : > { %604 = dma.done.wait (%p482_p0), [#allocation5], 4096  }
  0x36   : > { %606 = vsyncadd (%p482_p0), [#allocation5], 4294963200  ;;  %s717_s5 = sshll.u32 %s671_s17, 10  ;;  %vm306_vm0 = vcmask 1040384   ;;  %vm308_vm1 = vcmask 1041408   ;;  %vm310_vm2 = vcmask 1042432  }
  0x37   : > { %s720_s6 = sld [smem:[#allocation3 + %s717_s5]]  ;;  %s123_s7 = sadd.s32 1, %s717_s5  ;;  %vm312_vm3 = vcmask 1043456   ;;  %vm314_vm4 = vcmask 1044480   ;;  %vm316_vm5 = vcmask 1045504   ;;  %vm318_vm6 = vcmask 1046528  }
  0x38   : > { %s723_s8 = sld [smem:[#allocation3 + %s123_s7]]  ;;  %s128_s9 = sadd.s32 2, %s717_s5 }
  0x39   : > { %s726_s10 = sld [smem:[#allocation3 + %s128_s9]]  ;;  %s133_s11 = sadd.s32 3, %s717_s5 }
  0x3a   : > { %s729_s12 = sld [smem:[#allocation3 + %s133_s11]]  ;;  %s448_s13 = sadd.s32 128, %s717_s5 }
  0x3b   : > { %s140_s18 = sld [smem:[#allocation3 + %s448_s13]]  ;;  %s144_s20 = sadd.s32 1, %s448_s13 }
  0x3c   : > { %s145_s21 = sld [smem:[#allocation3 + %s144_s20]]  ;;  %s149_s25 = sadd.s32 2, %s448_s13 }
  0x3d   : > { %s154_s26 = sadd.s32 3, %s448_s13  ;;  %s732_s27 = sld [smem:[#allocation3 + %s149_s25]] }
  0x3e   : > { %s734_s28 = sld [smem:[#allocation3 + %s154_s26]]  ;;  %s450_s29 = sadd.s32 256, %s717_s5 }
  0x3f   : > { %s161_s30 = sld [smem:[#allocation3 + %s450_s29]]  ;;  %s165_s3 = sadd.s32 1, %s450_s29 }
  0x40   : > { %s166_s4 = sld [smem:[#allocation3 + %s165_s3]]  ;;  %s170_s7 = sadd.s32 2, %s450_s29 }
  0x41   : > { %s737_s9 = sld [smem:[#allocation3 + %s170_s7]]  ;;  %s175_s11 = sadd.s32 3, %s450_s29 }
  0x42   : > { %s739_s1 = sld [smem:[#allocation3 + %s175_s11]]  ;;  %s452_s22 = sadd.s32 384, %s717_s5 }
  0x43   : > { %s742_s20 = sld [smem:[#allocation3 + %s452_s22]]  ;;  %s186_s13 = sadd.s32 1, %s452_s22 }
  0x44   : > { %s191_s25 = sadd.s32 2, %s452_s22  ;;  %s744_s0 = sld [smem:[#allocation3 + %s186_s13]] }
  0x45   : > { %s746_s26 = sld [smem:[#allocation3 + %s191_s25]]  ;;  %s196_s19 = sadd.s32 3, %s452_s22 }
  0x46   : > { %s749_s24 = sadd.s32 512, %s717_s5  ;;  %s141_s3 = scalar_lea.vmem [#allocation4], %s140_s18 }
  0x47   : > { %v142_v0 = vld [vmem:[%s141_s3] sm:$0x1]  ;;  %s146_s29 = scalar_lea.vmem [#allocation4], %s145_s21  ;;  %s751_s7 = sld [smem:[#allocation3 + %s196_s19]] }
  0x48   : > { %v147_v1 = vld [vmem:[%s146_s29] sm:$0x1]  ;;  %s754_s11 = sld [smem:[#allocation3 + %s749_s24]]  ;;  %s120_s13 = scalar_lea.vmem [#allocation4], %s720_s6 }
  0x49   : > { %v121_v2 = vld [vmem:[%s120_s13] sm:$0x1]  ;;  %s207_s22 = sadd.s32 1, %s749_s24  ;;  %s212_s25 = sadd.s32 2, %s749_s24  ;;  %v148_v3 = vadd.f32 %v147_v1, %v142_v0 }
  0x4a   : > { %s162_s14 = scalar_lea.vmem [#allocation4], %s161_s30  ;;  %s167_s18 = scalar_lea.vmem [#allocation4], %s166_s4 }
  0x4b   : > { %v163_v4 = vld [vmem:[%s162_s14] sm:$0x1]  ;;  %s759_s21 = sld [smem:[#allocation3 + %s207_s22]]  ;;  %s125_s19 = scalar_lea.vmem [#allocation4], %s723_s8 }
  0x4c   : > { %v168_v5 = vld [vmem:[%s167_s18] sm:$0x1]  ;;  %s151_s3 = scalar_lea.vmem [#allocation4], %s732_s27  ;;  %s763_s6 = sld [smem:[#allocation3 + %s212_s25]] }
  0x4d   : > { %v126_v6 = vld [vmem:[%s125_s19] sm:$0x1]  ;;  %s217_s29 = sadd.s32 3, %s749_s24  ;;  %s767_s13 = sadd.s32 640, %s717_s5  ;;  %v169_v8 = vadd.f32 %v168_v5, %v163_v4 }
  0x4e   : > { %v152_v7 = vld [vmem:[%s151_s3] sm:$0x1]  ;;  %s183_s14 = scalar_lea.vmem [#allocation4], %s742_s20  ;;  %s188_s30 = scalar_lea.vmem [#allocation4], %s744_s0  ;;  %v127_v11 = vadd.f32 %v126_v6, %v121_v2 }
  0x4f   : > { %v184_v9 = vld [vmem:[%s183_s14] sm:$0x1]  ;;  %s771_s8 = sld [smem:[#allocation3 + %s217_s29]]  ;;  %v153_v12 = vadd.f32 %v152_v7, %v148_v3  ;;  %s172_s27 = scalar_lea.vmem [#allocation4], %s737_s9 }
  0x50   : > { %v189_v10 = vld [vmem:[%s188_s30] sm:$0x1]  ;;  %s775_s24 = sld [smem:[#allocation3 + %s767_s13]]  ;;  %s130_s4 = scalar_lea.vmem [#allocation4], %s726_s10 }
  0x51   : > { %v173_v13 = vld [vmem:[%s172_s27] sm:$0x1]  ;;  %s156_s22 = scalar_lea.vmem [#allocation4], %s734_s28  ;;  %s228_s20 = sadd.s32 1, %s767_s13  ;;  %v190_v16 = vadd.f32 %v189_v10, %v184_v9 }
  0x52   : > { %v131_v14 = vld [vmem:[%s130_s4] sm:$0x1]  ;;  %s233_s25 = sadd.s32 2, %s767_s13  ;;  %s204_s0 = scalar_lea.vmem [#allocation4], %s754_s11  ;;  %v174_v18 = vadd.f32 %v173_v13, %v169_v8 }
  0x53   : > { %v157_v15 = vld [vmem:[%s156_s22] sm:$0x1]  ;;  %s782_s18 = sld [smem:[#allocation3 + %s228_s20]]  ;;  %s193_s9 = scalar_lea.vmem [#allocation4], %s746_s26  ;;  %v132_v21 = vadd.f32 %v131_v14, %v127_v11 }
  0x54   : > { %v205_v17 = vld [vmem:[%s204_s0] sm:$0x1]  ;;  %s209_s19 = scalar_lea.vmem [#allocation4], %s759_s21  ;;  %s786_s10 = sld [smem:[#allocation3 + %s233_s25]]  ;;  %v158_v22 = vadd.f32 %v157_v15, %v153_v12 }
  0x55   : > { %v194_v19 = vld [vmem:[%s193_s9] sm:$0x1]  ;;  %s177_s28 = scalar_lea.vmem [#allocation4], %s739_s1  ;;  %s238_s3 = sadd.s32 3, %s767_s13 }
  0x56   : > { %v210_v20 = vld [vmem:[%s209_s19] sm:$0x1]  ;;  %s791_s29 = sadd.s32 768, %s717_s5  ;;  %s135_s11 = scalar_lea.vmem [#allocation4], %s729_s12  ;;  %v195_v26 = vadd.f32 %v194_v19, %v190_v16  ;;  %v286_v32 = vrot.slane %v158_v22, 7 }
  0x57   : > { %v178_v23 = vld [vmem:[%s177_s28] sm:$0x1]  ;;  %v211_v25 = vadd.f32 %v210_v20, %v205_v17  ;;  %s794_s26 = sld [smem:[#allocation3 + %s238_s3]]  ;;  %s214_s21 = scalar_lea.vmem [#allocation4], %s763_s6 }
  0x58   : > { %v136_v24 = vld [vmem:[%s135_s11] sm:$0x1]  ;;  %s798_s14 = sld [smem:[#allocation3 + %s791_s29]]  ;;  %v179_v28 = vadd.f32 %v178_v23, %v174_v18  ;;  %s198_s1 = scalar_lea.vmem [#allocation4], %s751_s7 }
  0x59   : > { %v215_v27 = vld [vmem:[%s214_s21] sm:$0x1]  ;;  %s225_s13 = scalar_lea.vmem [#allocation4], %s775_s24  ;;  %s249_s30 = sadd.s32 1, %s791_s29  ;;  %v137_v31 = vadd.f32 %v136_v24, %v132_v21 }
  0x5a   : > { %v199_v29 = vld [vmem:[%s198_s1] sm:$0x1]  ;;  %s254_s12 = sadd.s32 2, %s791_s29  ;;  %s804_s27 = sld [smem:[#allocation3 + %s249_s30]]  ;;  %v216_v33 = vadd.f32 %v215_v27, %v211_v25  ;;  %v289_v39 = vrot.slane %v179_v28, 6 }
  0x5b   : > { %v226_v30 = vld [vmem:[%s225_s13] sm:$0x1]  ;;  %s230_s6 = scalar_lea.vmem [#allocation4], %s782_s18  ;;  %s807_s4 = sld [smem:[#allocation3 + %s254_s12]]  ;;  %v200_v35 = vadd.f32 %v199_v29, %v195_v26  ;;  %v307_v41 = vsel %vm306_vm0, %v137_v31, %v286_v32 }
  0x5c   : > { %v231_v34 = vld [vmem:[%s230_s6] sm:$0x1]  ;;  %s219_s7 = scalar_lea.vmem [#allocation4], %s771_s8  ;;  %s235_s24 = scalar_lea.vmem [#allocation4], %s786_s10  ;;  %v309_v47 = vsel %vm308_vm1, %v307_v41, %v289_v39 }
  0x5d   : > { %v220_v36 = vld [vmem:[%s219_s7] sm:$0x1]  ;;  %v232_v37 = vadd.f32 %v231_v34, %v226_v30  ;;  %s259_s22 = sadd.s32 3, %s791_s29  ;;  %s460_s20 = sadd.s32 896, %s717_s5  ;;  %v292_v45 = vrot.slane %v200_v35, 5 }
  0x5e   : > { %v236_v38 = vld [vmem:[%s235_s24] sm:$0x1]  ;;  %s813_s25 = sld [smem:[#allocation3 + %s259_s22]]  ;;  %v221_v42 = vadd.f32 %v220_v36, %v216_v33  ;;  %s240_s18 = scalar_lea.vmem [#allocation4], %s794_s26 }
  0x5f   : > { %v237_v40 = vadd.f32 %v236_v38, %v232_v37  ;;  %s815_s0 = sld [smem:[#allocation3 + %s460_s20]]  ;;  %v241_v43 = vld [vmem:[%s240_s18] sm:$0x1]  ;;  %s246_s8 = scalar_lea.vmem [#allocation4], %s798_s14  ;;  %v311_v54 = vsel %vm310_vm2, %v309_v47, %v292_v45 }
  0x60   : > { %v247_v44 = vld [vmem:[%s246_s8] sm:$0x1]  ;;  %s270_s9 = sadd.s32 1, %s460_s20  ;;  %s275_s19 = sadd.s32 2, %s460_s20  ;;  %v295_v51 = vrot.slane %v221_v42, 4 }
  0x61   : > { %s271_s10 = sld [smem:[#allocation3 + %s270_s9]]  ;;  %s251_s5 = scalar_lea.vmem [#allocation4], %s804_s27  ;;  %v242_v48 = vadd.f32 %v241_v43, %v237_v40 }
  0x62   : > { %v252_v46 = vld [vmem:[%s251_s5] sm:$0x1]  ;;  %s276_s28 = sld [smem:[#allocation3 + %s275_s19]]  ;;  %s256_s3 = scalar_lea.vmem [#allocation4], %s807_s4  ;;  %v313_v59 = vsel %vm312_vm3, %v311_v54, %v295_v51 }
  0x63   : > { %v253_v49 = vadd.f32 %v252_v46, %v247_v44  ;;  %v257_v50 = vld [vmem:[%s256_s3] sm:$0x1]  ;;  %s280_s29 = sadd.s32 3, %s460_s20  ;;  %s114_s21 = sand.u32 1, %s617_s15   ;;  %v298_v57 = vrot.slane %v242_v48, 3 }
  0x64   : > { %s281_s11 = sld [smem:[#allocation3 + %s280_s29]]  ;;  %s261_s26 = scalar_lea.vmem [#allocation4], %s813_s25 }
  0x65   : > { %v258_v52 = vadd.f32 %v257_v50, %v253_v49  ;;  %v262_v53 = vld [vmem:[%s261_s26] sm:$0x1]  ;;  %s267_s14 = scalar_lea.vmem [#allocation4], %s815_s0  ;;  %s432_s13 = sshll.u32 %s114_s21, 3  ;;  %v315_v1 = vsel %vm314_vm4, %v313_v59, %v298_v57 }
  0x66   : > { %v268_v55 = vld [vmem:[%s267_s14] sm:$0x1]  ;;  %s116_s27 = scalar_lea.vmem [#allocation7], %s432_s13  ;;  %s443_s4 = sshll.u32 %s671_s17, 7 }
  0x67   : > { %v263_v56 = vadd.f32 %v262_v53, %v258_v52  ;;  %s272_s1 = scalar_lea.vmem [#allocation4], %s271_s10  ;;  %s336_s6 = sshll.u32 %s116_s27, 4  ;;  %s337_s6 = int_to_ptr.vmem [resolvable:$true] %s336_s6 }
  0x68   : > { %v273_v58 = vld [vmem:[%s272_s1] sm:$0x1]  ;;  %s277_s30 = scalar_lea.vmem [#allocation4], %s276_s28  ;;  %s334_s22 = scalar_lea.hbm %s863_s2, %s443_s4 }
  0x69   : > { %v274_v60 = vadd.f32 %v273_v58, %v268_v55  ;;  %v278_v61 = vld [vmem:[%s277_s30] sm:$0x1]  ;;  %v301_v62 = vrot.slane %v263_v56, 2  ;;  %s323_s20 = scalar_lea.sflag [#allocation6], %s114_s21  ;;  %s559_s25 = scalar_lea.vmem %s337_s6, 128 }
  0x6a   : > { %s282_s12 = scalar_lea.vmem [#allocation4], %s281_s11  ;;  %p560_p11 = scmp.ne.s32.totalorder %s337_s6, %s559_s25 }
  0x6b   : > { %v279_v63 = vadd.f32 %v278_v61, %v274_v60  ;;  %v283_v0 = vld [vmem:[%s282_s12] sm:$0x1]  ;;  %v317_v3 = vsel %vm316_vm5, %v315_v1, %v301_v62  ;;  %s631_s0 = smov [#allocation7]  }
  0x6c   : > { %p561_p13 = pnand %p560_p11, %p688_p10  ;;  %s563_s18 = sshll.u32 %s631_s0, 4  ;;  %s564_s18 = int_to_ptr.vmem [resolvable:$false] %s563_s18 }
  0x6d   : > { %v284_v2 = vadd.f32 %v283_v0, %v279_v63  ;;  %s565_s8 = scalar_lea.vmem %s564_s18, 256  ;;  %p566_p1 = scmp.lt.s32.totalorder %s337_s6, %s564_s18 }
  0x6e   : > { %p562_p0 = pneg %p561_p13  ;;  %p567_p2 = scmp.lt.s32.totalorder %s565_s8, %s559_s25 }
  0x6f   : > { %v304_v4 = vrot.slane %v284_v2, 1 }
  0x70   : > { %p568_p3 = por %p567_p2, %p566_p1 }
  0x71   : > { %v319_v5 = vsel %vm318_vm6, %v317_v3, %v304_v4 }
  0x72   : > { %v320_v6 = vmul.f32 0.25, %v319_v5  ;;  %p569_p4 = pnand %p568_p3, %p562_p0 }
  0x74   : > { %321 = vst [vmem:[%s116_s27] sm:$0xff] %v320_v6 }
  0x75   : > { %572 = shalt.err (!%p569_p4)
}
  0x76   : > { %s573_s17 = scalar_lea.hbm %s334_s22, 128  ;;  %s577_s10 = scalar_lea.hbm %s863_s2, 512 }
  0x77   : > { %p574_p5 = scmp.ne.s32.totalorder %s334_s22, %s573_s17  ;;  %p578_p8 = scmp.lt.s32.totalorder %s334_s22, %s863_s2 }
  0x78   : > { %p579_p9 = scmp.lt.s32.totalorder %s577_s10, %s573_s17 }
  0x79   : > { %p575_p6 = pnand %p574_p5, %p688_p10 }
  0x7a   : > { %p580_p12 = por %p579_p9, %p578_p8 }
  0x7b   : > { %p576_p7 = pneg %p575_p6 }
  0x7d   : > { %p581_p11 = pnand %p580_p12, %p576_p7 }
  0x7f   : > { %584 = shalt.err (!%p581_p11)
}
  0x80   : > { %472 = dma.vmem_to_hbm [thread:$0]  (%p688_p10), %s337_s6, 128, %s334_s22, %s323_s20  }
  0x81 PF: > { %s879_s3 = sld [smem:[#allocation11_spill]]  ;;  %p484_p13 = scmp.ge.s32.totalorder %s625_s16, 2 }
  0x82   : > { %s880_s29 = sld [smem:[#allocation15_spill]] }
  0x87   : > { %s348_s11 = sand.u32 1, %s879_s3  }
  0x88   : > { %p881_p0 = scmp.ne.s32.totalorder %s880_s29, 0  ;;  %s349_s26 = scalar_lea.sflag [#allocation6], %s348_s11 }
  0x8a   : > { %p479_p1 = pnand %p484_p13, %p881_p0 }
  0x8c   : > { %p480_p2 = pneg %p479_p1 }
  0x8e   : > { %608 = dma.done.wait (%p480_p2), %s349_s26, 128  }
  0x8f   : > { %610 = vsyncadd (%p480_p2), %s349_s26, 4294967168  ;;  %s882_s16 = sld [smem:[#allocation13_spill]]  ;;  %s885_s14 = smov %s617_s15 }
  0x90   : > { %s883_s21 = sld [smem:[#allocation12_spill]] }
  0x91   : > { %s884_s0 = sld [smem:[#allocation14_spill]] }
  0x95   : > { %p19_p3 = scmp.ge.s32.totalorder %s882_s16, 6  }
  0x96   : > { %s886_s15 = smov %s883_s21 }
  0x97   :  { %21 = sbr.rel (!%p19_p3) target bundleno = 19 (0x13), region = 93 }
  0x9c   :  { %354 = vsyncpa [#allocation5], 1 }
  0x9d   :  { %356 = vsyncpa [#allocation5 + $0x1], 1 }
  0x9e   :  { %357 = vsyncpa [#allocation6], 1 }
  0x9f   :  { %359 = vsyncpa [#allocation6 + $0x1], 1 }

</bundles_post_ra>
